<compile_context>
chip_gen: v5e
topology: v5e:2x2
jax: 0.10.0
libtpu: 0.0.40
codegen_flags: <defaults>
</compile_context>

<pallas_src>
import jax
import jax.numpy as jnp
from jax.experimental import pallas as pl
from jax.experimental.pallas import tpu as pltpu

EPS = 1e-5  # PyTorch BatchNorm2d default eps


# ------------------------- Pallas kernels -------------------------

def _mm_stats_kernel(p_ref, w_ref, y_ref, st_ref):
    """Tiled matmul (conv1 + 1x1-downsample via combined weights) + per-tile BN stats.

    p_ref: (TM, Kp) bf16 im2col patches, w_ref: (Kp, 2*Cp) bf16,
    y_ref: (TM, 2*Cp) f32 pre-BN outputs, st_ref: (1, 2, 2*Cp) f32 [sum; sum(y^2)].
    """
    y = jnp.dot(p_ref[...], w_ref[...], preferred_element_type=jnp.float32)
    y_ref[...] = y
    s = jnp.sum(y, axis=0, keepdims=True)
    sq = jnp.sum(y * y, axis=0, keepdims=True)
    st_ref[0] = jnp.concatenate([s, sq], axis=0)


def _bn1_relu_conv2_kernel(y1_ref, sc_ref, sh_ref, w2_ref, y2_ref, st_ref, xpad_ref):
    """Fused bn1 + ReLU + in-kernel 3x3 conv2 (stride 1, pad 1) + per-image BN2 stats.

    y1_ref: (1, H1, W1, Cp) f32 pre-BN conv1 output, sc/sh: (1, Cp) f32 BN1 scale/shift,
    w2_ref: (9, Cp, Cp) bf16, y2_ref: (1, H1, W1, Cp) f32 pre-BN conv2 output,
    st_ref: (1, 2, Cp) f32, xpad_ref: (H1+2, W1+2, Cp) f32 VMEM scratch (zero halo).
    """
    H1, W1, C = y1_ref.shape[1], y1_ref.shape[2], y1_ref.shape[3]
    sc = sc_ref[...].reshape(1, 1, C)
    sh = sh_ref[...].reshape(1, 1, C)
    o1 = jnp.maximum(y1_ref[0] * sc + sh, 0.0)              # bn1 + relu, f32

    xpad_ref[...] = jnp.zeros_like(xpad_ref)                 # zero halo
    xpad_ref[1:H1 + 1, 1:W1 + 1, :] = o1                     # interior

    acc = jnp.zeros((H1 * W1, C), jnp.float32)
    for kh in range(3):
        for kw in range(3):
            patch = xpad_ref[kh:kh + H1, kw:kw + W1, :].reshape(H1 * W1, C)
            acc = acc + jnp.dot(patch.astype(jnp.bfloat16), w2_ref[kh * 3 + kw],
                                preferred_element_type=jnp.float32)

    y2_ref[0] = acc.reshape(H1, W1, C)
    st_ref[0] = jnp.concatenate([jnp.sum(acc, axis=0, keepdims=True),
                                 jnp.sum(acc * acc, axis=0, keepdims=True)], axis=0)


def _bn2_relu_add_kernel(y2_ref, yd_ref, sc2_ref, sh2_ref, scd_ref, shd_ref, o_ref):
    """Fused bn2 + ReLU, bn3 (identity), residual add, final ReLU."""
    o2 = jnp.maximum(y2_ref[...] * sc2_ref[...] + sh2_ref[...], 0.0)
    ident = yd_ref[...] * scd_ref[...] + shd_ref[...]
    o_ref[...] = jnp.maximum(o2 + ident, 0.0)


# ------------------------- wrappers / glue -------------------------

def _round_up(x, m):
    return ((x + m - 1) // m) * m


def _pick_tile(m):
    for t in (512, 256, 128):
        if m % t == 0:
            return t
    return m


def _im2col(x_nhwc, ksize, stride, padding):
    """x: (N, H, W, C) -> ((N*Hout*Wout, ksize*ksize*C), Hout, Wout); columns ordered (kh,kw,c)."""
    N, H, W, C = x_nhwc.shape
    xp = jnp.pad(x_nhwc, ((0, 0), (padding, padding), (padding, padding), (0, 0)))
    Hout = (H + 2 * padding - ksize) // stride + 1
    Wout = (W + 2 * padding - ksize) // stride + 1
    cols = []
    for kh in range(ksize):
        for kw in range(ksize):
            sl = xp[:, kh:kh + (Hout - 1) * stride + 1:stride,
                    kw:kw + (Wout - 1) * stride + 1:stride, :]
            cols.append(sl)
    patches = jnp.concatenate(cols, axis=-1)
    return patches.reshape(N * Hout * Wout, ksize * ksize * C), Hout, Wout


def init_resblock_params(key, in_channels, out_channels):
    ks = jax.random.split(key, 6)
    return {
        "conv1_w": 0.1 * jax.random.normal(ks[0], (out_channels, in_channels, 3, 3), jnp.float32),
        "conv1_b": 0.1 * jax.random.normal(ks[1], (out_channels,), jnp.float32),
        "conv2_w": 0.1 * jax.random.normal(ks[2], (out_channels, out_channels, 3, 3), jnp.float32),
        "conv2_b": 0.1 * jax.random.normal(ks[3], (out_channels,), jnp.float32),
        "down_w": 0.1 * jax.random.normal(ks[4], (out_channels, in_channels, 1, 1), jnp.float32),
        "down_b": 0.1 * jax.random.normal(ks[5], (out_channels,), jnp.float32),
        # PyTorch BatchNorm2d default init: weight=1, bias=0
        "bn1_g": jnp.ones((out_channels,), jnp.float32), "bn1_b": jnp.zeros((out_channels,), jnp.float32),
        "bn2_g": jnp.ones((out_channels,), jnp.float32), "bn2_b": jnp.zeros((out_channels,), jnp.float32),
        "bn3_g": jnp.ones((out_channels,), jnp.float32), "bn3_b": jnp.zeros((out_channels,), jnp.float32),
    }


def prepare_params(params, in_channels, out_channels):
    """One-time (hoisted) weight/param packing: lane-dense 128-padded, bf16 MXU operands."""
    Cin, Cout = in_channels, out_channels
    Cp = _round_up(Cout, 128)
    Kp = _round_up(9 * Cin, 128)

    # conv1 as (9*Cin, Cout) with row order (kh, kw, ci), matching im2col columns.
    w1 = jnp.transpose(params["conv1_w"], (2, 3, 1, 0)).reshape(9 * Cin, Cout)
    # 1x1 downsample as (Cin, Cout); it reads exactly the center tap of the 3x3 im2col rows,
    # so embed it at rows [4*Cin, 5*Cin) of a combined (Kp, 2*Cp) weight -> one shared matmul.
    wd = jnp.transpose(params["down_w"][:, :, 0, 0], (1, 0))
    w_comb = jnp.zeros((Kp, 2 * Cp), jnp.float32)
    w_comb = w_comb.at[:9 * Cin, :Cout].set(w1)
    center = (1 * 3 + 1) * Cin
    w_comb = w_comb.at[center:center + Cin, Cp:Cp + Cout].set(wd)

    # conv2 as (9, Cp, Cp), tap-major.
    w2 = jnp.transpose(params["conv2_w"], (2, 3, 1, 0)).reshape(9, Cout, Cout)
    w2_k = jnp.zeros((9, Cp, Cp), jnp.float32).at[:, :Cout, :Cout].set(w2)

    def padc(v):
        return jnp.zeros((Cp,), jnp.float32).at[:Cout].set(v)

    # Conv biases intentionally dropped: training-mode BN right after each conv cancels them.
    return {
        "w_comb": w_comb.astype(jnp.bfloat16),
        "w2_k": w2_k.astype(jnp.bfloat16),
        "g1": padc(params["bn1_g"]), "b1": padc(params["bn1_b"]),
        "g2": padc(params["bn2_g"]), "b2": padc(params["bn2_b"]),
        "g3": padc(params["bn3_g"]), "b3": padc(params["bn3_b"]),
        "Cin": Cin, "Cout": Cout, "Cp": Cp, "Kp": Kp,
    }


def resblock_forward(prep, x_nchw, stride):
    Cin, Cout, Cp, Kp = prep["Cin"], prep["Cout"], prep["Cp"], prep["Kp"]
    x = jnp.transpose(x_nchw, (0, 2, 3, 1)).astype(jnp.float32)  # NHWC
    N, H, W, _ = x.shape

    # ---- im2col for conv1 only (3x3, stride, pad 1); K padded to 128 lanes, bf16 ----
    patches, H1, W1 = _im2col(x, 3, stride, 1)
    M1 = N * H1 * W1
    patches = jnp.pad(patches, ((0, 0), (0, Kp - patches.shape[1]))).astype(jnp.bfloat16)

    TM = _pick_tile(M1)
    n_tiles = M1 // TM

    # ---- call 1: conv1 + 1x1 downsample as a single lane-dense matmul + per-tile BN stats ----
    ycomb, st1 = pl.pallas_call(
        _mm_stats_kernel,
        grid=(n_tiles,),
        in_specs=[pl.BlockSpec((TM, Kp), lambda i: (i, 0)),
                  pl.BlockSpec((Kp, 2 * Cp), lambda i: (0, 0))],
        out_specs=(pl.BlockSpec((TM, 2 * Cp), lambda i: (i, 0)),
                   pl.BlockSpec((1, 2, 2 * Cp), lambda i: (i, 0, 0))),
        out_shape=(jax.ShapeDtypeStruct((M1, 2 * Cp), jnp.float32),
                   jax.ShapeDtypeStruct((n_tiles, 2, 2 * Cp), jnp.float32)),
        compiler_params=pltpu.CompilerParams(dimension_semantics=("parallel",)),
        cost_estimate=pl.CostEstimate(
            flops=2 * M1 * Kp * 2 * Cp, transcendentals=0,
            bytes_accessed=M1 * Kp * 2 + Kp * 2 * Cp * 2 + M1 * 2 * Cp * 4),
    )(patches, prep["w_comb"])

    # Global BN stats (bn1 + bn3) from per-tile partial sums -> scale/shift (tiny XLA op).
    stats1 = jnp.sum(st1, axis=0)                       # (2, 2*Cp)
    mean1 = stats1[0] / M1
    var1 = jnp.maximum(stats1[1] / M1 - mean1 * mean1, 0.0)
    inv1 = jax.lax.rsqrt(var1 + EPS)
    sc1 = (prep["g1"] * inv1[:Cp]).reshape(1, Cp)
    sh1 = (prep["b1"] - mean1[:Cp] * prep["g1"] * inv1[:Cp]).reshape(1, Cp)
    scd = (prep["g3"] * inv1[Cp:]).reshape(1, Cp)
    shd = (prep["b3"] - mean1[Cp:] * prep["g3"] * inv1[Cp:]).reshape(1, Cp)

    y1_4d = ycomb.reshape(N, H1, W1, 2 * Cp)

    # ---- call 2: fused bn1+relu + in-kernel 3x3 conv2 + per-image BN2 stats ----
    y2, st2 = pl.pallas_call(
        _bn1_relu_conv2_kernel,
        grid=(N,),
        in_specs=[pl.BlockSpec((1, H1, W1, Cp), lambda n: (n, 0, 0, 0)),  # conv1 half of ycomb
                  pl.BlockSpec((1, Cp), lambda n: (0, 0)),
                  pl.BlockSpec((1, Cp), lambda n: (0, 0)),
                  pl.BlockSpec((9, Cp, Cp), lambda n: (0, 0, 0))],
        out_specs=(pl.BlockSpec((1, H1, W1, Cp), lambda n: (n, 0, 0, 0)),
                   pl.BlockSpec((1, 2, Cp), lambda n: (n, 0, 0))),
        out_shape=(jax.ShapeDtypeStruct((N, H1, W1, Cp), jnp.float32),
                   jax.ShapeDtypeStruct((N, 2, Cp), jnp.float32)),
        scratch_shapes=[pltpu.VMEM((H1 + 2, W1 + 2, Cp), jnp.float32)],
        compiler_params=pltpu.CompilerParams(dimension_semantics=("parallel",)),
        cost_estimate=pl.CostEstimate(
            flops=2 * N * 9 * H1 * W1 * Cp * Cp, transcendentals=0,
            bytes_accessed=2 * N * H1 * W1 * Cp * 4 + 9 * Cp * Cp * 2),
    )(y1_4d, sc1, sh1, prep["w2_k"])

    stats2 = jnp.sum(st2, axis=0)                       # (2, Cp)
    mean2 = stats2[0] / M1
    var2 = jnp.maximum(stats2[1] / M1 - mean2 * mean2, 0.0)
    inv2 = jax.lax.rsqrt(var2 + EPS)
    sc2 = (prep["g2"] * inv2).reshape(1, Cp)
    sh2 = (prep["b2"] - mean2 * prep["g2"] * inv2).reshape(1, Cp)

    y2_flat = y2.reshape(M1, Cp)

    # ---- call 3: bn2 + relu + bn3(identity) + add + final relu ----
    out_flat = pl.pallas_call(
        _bn2_relu_add_kernel,
        grid=(n_tiles,),
        in_specs=[pl.BlockSpec((TM, Cp), lambda i: (i, 0)),
                  pl.BlockSpec((TM, Cp), lambda i: (i, 1)),   # downsample half of ycomb
                  pl.BlockSpec((1, Cp), lambda i: (0, 0)),
                  pl.BlockSpec((1, Cp), lambda i: (0, 0)),
                  pl.BlockSpec((1, Cp), lambda i: (0, 0)),
                  pl.BlockSpec((1, Cp), lambda i: (0, 0))],
        out_specs=pl.BlockSpec((TM, Cp), lambda i: (i, 0)),
        out_shape=jax.ShapeDtypeStruct((M1, Cp), jnp.float32),
        compiler_params=pltpu.CompilerParams(dimension_semantics=("parallel",)),
    )(y2_flat, ycomb, sc2, sh2, scd, shd)

    out = out_flat.reshape(N, H1, W1, Cp)[:, :, :, :Cout]
    return jnp.transpose(out, (0, 3, 1, 2))  # back to NCHW


# ------------------------- pure-JAX reference (for validation) -------------------------

def _ref_forward(params, x_nchw, stride):
    x = x_nchw.astype(jnp.float32)

    def conv(inp, w, b, s, p):
        y = jax.lax.conv_general_dilated(inp, w, (s, s), [(p, p), (p, p)],
                                         dimension_numbers=("NCHW", "OIHW", "NCHW"))
        return y + b[None, :, None, None]

    def bn(y, g, b):
        mean = y.mean(axis=(0, 2, 3), keepdims=True)
        var = ((y - mean) ** 2).mean(axis=(0, 2, 3), keepdims=True)
        return (y - mean) * jax.lax.rsqrt(var + EPS) * g[None, :, None, None] + b[None, :, None, None]

    o = jax.nn.relu(bn(conv(x, params["conv1_w"], params["conv1_b"], stride, 1),
                       params["bn1_g"], params["bn1_b"]))
    o = jax.nn.relu(bn(conv(o, params["conv2_w"], params["conv2_b"], 1, 1),
                       params["bn2_g"], params["bn2_b"]))
    ident = bn(conv(x, params["down_w"], params["down_b"], stride, 0),
               params["bn3_g"], params["bn3_b"])
    return jax.nn.relu(o + ident)


if __name__ == "__main__":
    key = jax.random.PRNGKey(0)
    k_x, k_p = jax.random.split(key)

    in_channels, out_channels, stride = 4, 8, 2
    x = jax.random.normal(k_x, (2, in_channels, 16, 16), jnp.float32)  # NCHW, like PyTorch

    params = init_resblock_params(k_p, in_channels, out_channels)
    prep = prepare_params(params, in_channels, out_channels)   # hoisted, one-time packing

    out = resblock_forward(prep, x, stride)
    out = jax.block_until_ready(out)

    assert out.shape == (2, out_channels, 8, 8), out.shape
    assert bool(jnp.all(jnp.isfinite(out)))
    assert bool(jnp.all(out >= 0.0))  # final ReLU

    ref = _ref_forward(params, x, stride)
    max_err = float(jnp.max(jnp.abs(out - ref)))
    assert bool(jnp.allclose(out, ref, atol=0.1, rtol=0.1)), max_err

    print("KERNEL_OK")
</pallas_src>

<mosaic_0001>
module attributes {stable_mosaic.version = 11 : i64} {
  func.func @_mm_stats_kernel(%arg0: i32, %arg1: memref<128x128xbf16, #tpu.memory_space<vmem>>, %arg2: memref<128x256xbf16, #tpu.memory_space<vmem>>, %arg3: memref<128x256xf32, #tpu.memory_space<vmem>>, %arg4: memref<1x2x256xf32, #tpu.memory_space<vmem>>) attributes {dimension_semantics = [#tpu.dimension_semantics<parallel>], iteration_bounds = array<i64: 1>, scalar_prefetch = 0 : i64, scratch_operands = 0 : i64, tpu.core_type = #tpu.core_type<tc>, window_params = [{transform_indices = @transform_0, window_bounds = array<i64: 128, 128>}, {pipeline_mode = #tpu.pipeline_mode<synchronous>, transform_indices = @transform_1, window_bounds = array<i64: 128, 256>}, {transform_indices = @transform_2, window_bounds = array<i64: 128, 256>}, {transform_indices = @transform_3, window_bounds = array<i64: 1, 2, 256>}]} {
    %c0 = arith.constant 0 : index
    %c0_0 = arith.constant 0 : index
    %0 = vector.load %arg1[%c0, %c0_0] : memref<128x128xbf16, #tpu.memory_space<vmem>>, vector<128x128xbf16>
    %c0_1 = arith.constant 0 : index
    %c0_2 = arith.constant 0 : index
    %1 = vector.load %arg2[%c0_1, %c0_2] : memref<128x256xbf16, #tpu.memory_space<vmem>>, vector<128x256xbf16>
    %cst = arith.constant dense<0.000000e+00> : vector<128x256xf32>
    %2 = tpu.matmul %0, %1, %cst {dimension_numbers = #tpu.dot_dimension_numbers<[1], [0], [0], [1], [0, 0, 1, 1], [], []>} : vector<128x128xbf16>, vector<128x256xbf16>, vector<128x256xf32> -> vector<128x256xf32>
    %c0_3 = arith.constant 0 : index
    %c0_4 = arith.constant 0 : index
    %3 = vector.load %arg3[%c0_3, %c0_4] : memref<128x256xf32, #tpu.memory_space<vmem>>, vector<128x256xf32>
    tpu.vector_store %arg3[%c0_3, %c0_4], %2 {strides = array<i32>} : memref<128x256xf32, #tpu.memory_space<vmem>>, vector<128x256xf32>,
    %cst_5 = arith.constant dense<0.000000e+00> : vector<256xf32>
    %4 = vector.multi_reduction <add>, %2, %cst_5 [0] : vector<128x256xf32> to vector<256xf32>
    %5 = vector.shape_cast %4 : vector<256xf32> to vector<1x256xf32>
    %6 = arith.mulf %2, %2 : vector<128x256xf32>
    %cst_6 = arith.constant dense<0.000000e+00> : vector<256xf32>
    %7 = vector.multi_reduction <add>, %6, %cst_6 [0] : vector<128x256xf32> to vector<256xf32>
    %8 = vector.shape_cast %7 : vector<256xf32> to vector<1x256xf32>
    %9 = tpu.concatenate %5, %8 in 0 : vector<1x256xf32>, vector<1x256xf32> -> vector<2x256xf32>
    %c0_7 = arith.constant 0 : index
    %c0_8 = arith.constant 0 : index
    %c0_9 = arith.constant 0 : index
    %10 = vector.load %arg4[%c0_7, %c0_8, %c0_9] : memref<1x2x256xf32, #tpu.memory_space<vmem>>, vector<1x2x256xf32>
    %11 = vector.shape_cast %10 : vector<1x2x256xf32> to vector<2x256xf32>
    %12 = vector.shape_cast %9 : vector<2x256xf32> to vector<1x2x256xf32>
    tpu.vector_store %arg4[%c0_7, %c0_8, %c0_9], %12 {strides = array<i32>} : memref<1x2x256xf32, #tpu.memory_space<vmem>>, vector<1x2x256xf32>,
    return
  }
  func.func @transform_0(%arg0: i32) -> (i32, i32) {
    %c0_i32 = arith.constant 0 : i32
    %c0_i32_0 = arith.constant 0 : i32
    return %arg0, %c0_i32 : i32, i32
  }
  func.func @transform_1(%arg0: i32) -> (i32, i32) {
    %c0_i32 = arith.constant 0 : i32
    %c0_i32_0 = arith.constant 0 : i32
    %c0_i32_1 = arith.constant 0 : i32
    return %c0_i32, %c0_i32_0 : i32, i32
  }
  func.func @transform_2(%arg0: i32) -> (i32, i32) {
    %c0_i32 = arith.constant 0 : i32
    %c0_i32_0 = arith.constant 0 : i32
    return %arg0, %c0_i32 : i32, i32
  }
  func.func @transform_3(%arg0: i32) -> (i32, i32, i32) {
    %c0_i32 = arith.constant 0 : i32
    %c0_i32_0 = arith.constant 0 : i32
    %c0_i32_1 = arith.constant 0 : i32
    return %arg0, %c0_i32, %c0_i32_0 : i32, i32, i32
  }
}

</mosaic_0001>

<bundles_post_ra>
// kernel: tpu_custom_call.1
= control target key start
LH: loop header
LB: loop body
LE: loop exit
PB: predicated region body
PF: predicated region fallthrough
CT: control target
= control target key end

     0   :  { %9 = vsyncpa [#allocation3], 0  ;;  %s878_s0 = inlined_call_operand.hbm [shape: bf16[128,128], index: 0, kind: input, shape index: {}]   ;;  %s879_s1 = inlined_call_operand.hbm [shape: bf16[128,256], index: 1, kind: input, shape index: {}]   ;;  %s880_s2 = inlined_call_operand.hbm [shape: f32[128,256], index: 2, kind: output, shape index: {0}]   ;;  %s881_s3 = inlined_call_operand.hbm [shape: f32[1,2,256], index: 3, kind: output, shape index: {1}]  }
   0x1   :  { %10 = vsyncpa [#allocation6], 0 }
   0x2   :  { %11 = vsyncpa [#allocation4], 0 }
   0x3   :  { %12 = vsyncpa [#allocation9], 0  ;;  %s17_s14 = sshll.u32 %s878_s0, 4  ;;  %s749_s15 = smov [#allocation2]   ;;  %s18_s14 = int_to_ptr.hbm [resolvable:$true] %s17_s14 }
   0x4   :  { %s19_s16 = sshll.u32 %s749_s15, 4  ;;  %s30_s19 = sshll.u32 %s879_s1, 4  ;;  %s20_s16 = int_to_ptr.vmem [resolvable:$true] %s19_s16  ;;  %s31_s19 = int_to_ptr.hbm [resolvable:$true] %s30_s19 }
   0x5   :  { %s750_s20 = smov 64   ;;  %s751_s21 = smov 4  }
   0x6   :  { %25 = dma.hbm_to_vmem [thread:$0]  %s18_s14, 1024, %s20_s16, [#allocation3], %s750_s20, %s750_s20, %s751_s21  }
   0x7   :  { %s752_s22 = smov [#allocation5]   ;;  %s753_s24 = smov 128  }
   0x8   :  { %s32_s23 = sshll.u32 %s752_s22, 4  ;;  %s754_s25 = smov 8   ;;  %s33_s23 = int_to_ptr.vmem [resolvable:$true] %s32_s23 }
   0x9   :  { %38 = dma.hbm_to_vmem [thread:$0]  %s31_s19, 2048, %s33_s23, [#allocation6], %s753_s24, %s753_s24, %s754_s25  }
   0xa   :  { %741 = dma.done.wait [#allocation3], 1024  }
   0xb   :  { %742 = vsyncadd [#allocation3], 4294966272 }
   0xc   :  { %743 = dma.done.wait [#allocation6], 2048  }
   0xd   :  { %744 = vsyncadd [#allocation6], 4294965248  ;;  %v589_v0 = vld [vmem:[#allocation5 + $0x70] sm:$0xf]  ;;  %v618_v1 = vld [vmem:[#allocation5 + $0x74] sm:$0xf0] }
   0xe   :  { %v617_v2 = vld [vmem:[#allocation5 + $0x74] sm:$0xf]  ;;  %v590_v3 = vor.u32 %v618_v1, %v589_v0  ;;  %v591_v4 = vld [vmem:[#allocation5 + $0x78] sm:$0xf0]  ;;  %v581_v5 = vld [vmem:[#allocation5 + $0x60] sm:$0xf] }
   0xf   :  { %v616_v6 = vld [vmem:[#allocation5 + $0x64] sm:$0xf0]  ;;  %v594_v7 = vor.u32 %v617_v2, %v591_v4  ;;  %v615_v8 = vld [vmem:[#allocation5 + $0x64] sm:$0xf]  ;;  %v583_v9 = vld [vmem:[#allocation5 + $0x68] sm:$0xf0] }
  0x10   :  { %207 = vmatpush.bf16.msra.mxu0 %v590_v3  ;;  %619 = vmatpush.bf16.msra.mxu2 %v590_v3  ;;  %v582_v10 = vor.u32 %v616_v6, %v581_v5  ;;  %v586_v11 = vor.u32 %v615_v8, %v583_v9  ;;  %v573_v12 = vld [vmem:[#allocation5 + $0x50] sm:$0xf]  ;;  %v614_v13 = vld [vmem:[#allocation5 + $0x54] sm:$0xf0]  ;;  %v613_v14 = vld [vmem:[#allocation5 + $0x54] sm:$0xf] }
  0x11   :  { %256 = vmatpush.bf16.msra.mxu1 %v594_v7  ;;  %627 = vmatpush.bf16.msra.mxu3 %v594_v7  ;;  %v575_v15 = vld [vmem:[#allocation5 + $0x58] sm:$0xf0]  ;;  %v574_v16 = vor.u32 %v614_v13, %v573_v12  ;;  %v565_v18 = vld [vmem:[#allocation5 + $0x40] sm:$0xf]  ;;  %v612_v19 = vld [vmem:[#allocation5 + $0x44] sm:$0xf0] }
  0x12   :  { %v578_v17 = vor.u32 %v613_v14, %v575_v15  ;;  %v611_v20 = vld [vmem:[#allocation5 + $0x44] sm:$0xf]  ;;  %v567_v21 = vld [vmem:[#allocation5 + $0x48] sm:$0xf0]  ;;  %v566_v22 = vor.u32 %v612_v19, %v565_v18  ;;  %v557_v24 = vld [vmem:[#allocation5 + $0x30] sm:$0xf] }
  0x13   :  { %v570_v23 = vor.u32 %v611_v20, %v567_v21  ;;  %v610_v25 = vld [vmem:[#allocation5 + $0x34] sm:$0xf0]  ;;  %v609_v26 = vld [vmem:[#allocation5 + $0x34] sm:$0xf]  ;;  %v559_v27 = vld [vmem:[#allocation5 + $0x38] sm:$0xf0] }
  0x14   :  { %208 = vmatpush.bf16.msra.mxu0 %v582_v10  ;;  %620 = vmatpush.bf16.msra.mxu2 %v582_v10  ;;  %v558_v28 = vor.u32 %v610_v25, %v557_v24  ;;  %v562_v29 = vor.u32 %v609_v26, %v559_v27  ;;  %v549_v30 = vld [vmem:[#allocation5 + $0x20] sm:$0xf]  ;;  %v608_v31 = vld [vmem:[#allocation5 + $0x24] sm:$0xf0]  ;;  %v607_v32 = vld [vmem:[#allocation5 + $0x24] sm:$0xf] }
  0x15   :  { %257 = vmatpush.bf16.msra.mxu1 %v586_v11  ;;  %628 = vmatpush.bf16.msra.mxu3 %v586_v11  ;;  %v551_v33 = vld [vmem:[#allocation5 + $0x28] sm:$0xf0]  ;;  %v550_v34 = vor.u32 %v608_v31, %v549_v30  ;;  %v541_v36 = vld [vmem:[#allocation5 + $0x10] sm:$0xf]  ;;  %v606_v37 = vld [vmem:[#allocation5 + $0x14] sm:$0xf0] }
  0x16   :  { %v554_v35 = vor.u32 %v607_v32, %v551_v33  ;;  %v605_v38 = vld [vmem:[#allocation5 + $0x14] sm:$0xf]  ;;  %v543_v39 = vld [vmem:[#allocation5 + $0x18] sm:$0xf0]  ;;  %v542_v40 = vor.u32 %v606_v37, %v541_v36  ;;  %v533_v42 = vld [vmem:[#allocation5] sm:$0xf] }
  0x17   :  { %v546_v41 = vor.u32 %v605_v38, %v543_v39  ;;  %v604_v43 = vld [vmem:[#allocation5 + $0x4] sm:$0xf0]  ;;  %v603_v44 = vld [vmem:[#allocation5 + $0x4] sm:$0xf]  ;;  %v535_v45 = vld [vmem:[#allocation5 + $0x8] sm:$0xf0] }
  0x18   :  { %209 = vmatpush.bf16.msra.mxu0 %v574_v16  ;;  %621 = vmatpush.bf16.msra.mxu2 %v574_v16  ;;  %v534_v46 = vor.u32 %v604_v43, %v533_v42  ;;  %v538_v47 = vor.u32 %v603_v44, %v535_v45  ;;  %v595_v48 = vld [vmem:[#allocation2] sm:$0xff]  ;;  %v596_v50 = vld [vmem:[#allocation2 + $0x8] sm:$0xff]  ;;  %v597_v52 = vld [vmem:[#allocation2 + $0x10] sm:$0xff]  ;;  %s755_s0 = smov [#allocation7]   ;;  %s469_s28 = sshll.u32 %s880_s2, 4  ;;  %vm453_vm0 = vcmask 1040384   ;;  %s470_s28 = int_to_ptr.hbm [resolvable:$true] %s469_s28 }
  0x19   :  { %258 = vmatpush.bf16.msra.mxu1 %v578_v17  ;;  %629 = vmatpush.bf16.msra.mxu3 %v578_v17  ;;  %v599_v49 = vld [vmem:[#allocation2 + $0x20] sm:$0xff]  ;;  %v600_v51 = vld [vmem:[#allocation2 + $0x28] sm:$0xff]  ;;  %v601_v53 = vld [vmem:[#allocation2 + $0x30] sm:$0xff]  ;;  %s827_s1 = sshll.u32 %s755_s0, 4  ;;  %s756_s2 = smov 256   ;;  %vm459_vm1 = vcmask 1041408   ;;  %s468_s1 = int_to_ptr.vmem [resolvable:$true] %s827_s1 }
  0x1a   :  { %v598_v54 = vld [vmem:[#allocation2 + $0x18] sm:$0xff]  ;;  %s757_s29 = smov 16   ;;  %s758_s30 = smov [#allocation8]  }
  0x1b   :  { %v602_v55 = vld [vmem:[#allocation2 + $0x38] sm:$0xff]  ;;  %s481_s4 = sshll.u32 %s758_s30, 4  ;;  %s483_s7 = sshll.u32 %s881_s3, 4  ;;  %s482_s4 = int_to_ptr.vmem [resolvable:$true] %s481_s4  ;;  %s484_s7 = int_to_ptr.hbm [resolvable:$true] %s483_s7 }
  0x1c   :  { %210 = vmatpush.bf16.msra.mxu0 %v566_v22  ;;  %622 = vmatpush.bf16.msra.mxu2 %v566_v22 }
  0x1d   :  { %259 = vmatpush.bf16.msra.mxu1 %v570_v23  ;;  %630 = vmatpush.bf16.msra.mxu3 %v570_v23 }
  0x20   :  { %211 = vmatpush.bf16.msra.mxu0 %v558_v28  ;;  %623 = vmatpush.bf16.msra.mxu2 %v558_v28 }
  0x21   :  { %260 = vmatpush.bf16.msra.mxu1 %v562_v29  ;;  %631 = vmatpush.bf16.msra.mxu3 %v562_v29 }
  0x24   :  { %212 = vmatpush.bf16.msra.mxu0 %v550_v34  ;;  %624 = vmatpush.bf16.msra.mxu2 %v550_v34 }
  0x25   :  { %261 = vmatpush.bf16.msra.mxu1 %v554_v35  ;;  %632 = vmatpush.bf16.msra.mxu3 %v554_v35 }
  0x28   :  { %213 = vmatpush.bf16.msra.mxu0 %v542_v40  ;;  %625 = vmatpush.bf16.msra.mxu2 %v542_v40 }
  0x29   :  { %262 = vmatpush.bf16.msra.mxu1 %v546_v41  ;;  %633 = vmatpush.bf16.msra.mxu3 %v546_v41 }
  0x2c   :  { %214 = vmatpush.bf16.msra.mxu0 %v534_v46  ;;  %626 = vmatpush.bf16.msra.mxu2 %v534_v46 }
  0x2d   :  { %263 = vmatpush.bf16.msra.mxu1 %v538_v47  ;;  %634 = vmatpush.bf16.msra.mxu3 %v538_v47 }
  0x2f   :  { %215 = vmatmul.bf16.vlgmr.msra.gmra.mxu0 %v595_v48  ;;  %235 = vmatmul.bf16.vlgmr.msra.gmra.mxu2 %v599_v49 }
  0x30   :  { %264 = vmatmul.bf16.vlgmr.msra.gmra.mxu1 %v595_v48  ;;  %284 = vmatmul.bf16.vlgmr.msra.gmra.mxu3 %v599_v49 }
  0x3f   :  { %220 = vmatmul.bf16.gmra.mxu0 %v596_v50  ;;  %240 = vmatmul.bf16.gmra.mxu2 %v600_v51 }
  0x40   :  { %269 = vmatmul.bf16.gmra.mxu1 %v596_v50  ;;  %289 = vmatmul.bf16.gmra.mxu3 %v600_v51 }
  0x4f   :  { %225 = vmatmul.bf16.gmra.mxu0 %v597_v52  ;;  %245 = vmatmul.bf16.gmra.mxu2 %v601_v53 }
  0x50   :  { %274 = vmatmul.bf16.gmra.mxu1 %v597_v52  ;;  %294 = vmatmul.bf16.gmra.mxu3 %v601_v53 }
  0x5f   :  { %230 = vmatmul.bf16.gmra.mxu0 %v598_v54  ;;  %250 = vmatmul.bf16.gmra.mxu2 %v602_v55 }
  0x60   :  { %279 = vmatmul.bf16.gmra.mxu1 %v598_v54  ;;  %299 = vmatmul.bf16.gmra.mxu3 %v602_v55 }
  0xac   :  { %v216_v56 = vpop.f32.mrf.mxu0 }
  0xad   :  { %305 = vst [vmem:[#allocation7] sm:$0xff] %v216_v56  ;;  %v265_v57 = vpop.f32.mrf.mxu1  ;;  %v379_v16 = vmul.f32 %v216_v56, %v216_v56 }
  0xae   :  { %306 = vst [vmem:[#allocation7 + $0x8] sm:$0xff] %v265_v57  ;;  %v380_v19 = vmul.f32 %v265_v57, %v265_v57 }
  0xb2   :  { %v785_v58 = vpop.f32.mrf.mxu2 }
  0xb3   :  { %v787_v59 = vpop.f32.mrf.mxu3  ;;  %321 = vst [vmem:[#allocation7 + $0x80] sm:$0xff] %v785_v58 }
  0xb4   :  { %v218_v60 = vpop.f32.mrf.mxu0  ;;  %322 = vst [vmem:[#allocation7 + $0x88] sm:$0xff] %v787_v59 }
  0xb5   :  { %307 = vst [vmem:[#allocation7 + $0x10] sm:$0xff] %v218_v60  ;;  %v267_v61 = vpop.f32.mrf.mxu1  ;;  %v381_v14 = vmul.f32 %v218_v60, %v218_v60  ;;  %v337_v17 = vadd.f32 %v218_v60, %v216_v56 }
  0xb6   :  { %308 = vst [vmem:[#allocation7 + $0x18] sm:$0xff] %v267_v61  ;;  %v382_v15 = vmul.f32 %v267_v61, %v267_v61  ;;  %v358_v20 = vadd.f32 %v267_v61, %v265_v57 }
  0xb7   :  { %v411_v23 = vadd.f32 %v381_v14, %v379_v16 }
  0xb8   :  { %v432_v27 = vadd.f32 %v382_v15, %v380_v19 }
  0xba   :  { %v791_v62 = vpop.f32.mrf.mxu2 }
  0xbb   :  { %v793_v63 = vpop.f32.mrf.mxu3  ;;  %323 = vst [vmem:[#allocation7 + $0x90] sm:$0xff] %v791_v62  ;;  %v397_v16 = vmul.f32 %v791_v62, %v791_v62 }
  0xbc   :  { %v221_v0 = vpop.f32.mrf.mxu0  ;;  %324 = vst [vmem:[#allocation7 + $0x98] sm:$0xff] %v793_v63  ;;  %v398_v19 = vmul.f32 %v793_v63, %v793_v63 }
  0xbd   :  { %309 = vst [vmem:[#allocation7 + $0x20] sm:$0xff] %v221_v0  ;;  %v270_v1 = vpop.f32.mrf.mxu1  ;;  %v383_v18 = vmul.f32 %v221_v0, %v221_v0  ;;  %v338_v24 = vadd.f32 %v337_v17, %v221_v0 }
  0xbe   :  { %310 = vst [vmem:[#allocation7 + $0x28] sm:$0xff] %v270_v1  ;;  %v384_v21 = vmul.f32 %v270_v1, %v270_v1  ;;  %v359_v28 = vadd.f32 %v358_v20, %v270_v1 }
  0xbf   :  { %v412_v31 = vadd.f32 %v411_v23, %v383_v18 }
  0xc0   :  { %v433_v35 = vadd.f32 %v432_v27, %v384_v21 }
  0xc2   :  { %v797_v2 = vpop.f32.mrf.mxu2 }
  0xc3   :  { %v799_v3 = vpop.f32.mrf.mxu3  ;;  %325 = vst [vmem:[#allocation7 + $0xa0] sm:$0xff] %v797_v2  ;;  %v399_v23 = vmul.f32 %v797_v2, %v797_v2 }
  0xc4   :  { %v223_v4 = vpop.f32.mrf.mxu0  ;;  %326 = vst [vmem:[#allocation7 + $0xa8] sm:$0xff] %v799_v3 }
  0xc5   :  { %311 = vst [vmem:[#allocation7 + $0x30] sm:$0xff] %v223_v4  ;;  %v272_v5 = vpop.f32.mrf.mxu1  ;;  %v385_v25 = vmul.f32 %v223_v4, %v223_v4  ;;  %v339_v32 = vadd.f32 %v338_v24, %v223_v4 }
  0xc6   :  { %312 = vst [vmem:[#allocation7 + $0x38] sm:$0xff] %v272_v5  ;;  %v386_v29 = vmul.f32 %v272_v5, %v272_v5  ;;  %v360_v36 = vadd.f32 %v359_v28, %v272_v5 }
  0xc7   :  { %v413_v38 = vadd.f32 %v412_v31, %v385_v25 }
  0xc8   :  { %v434_v41 = vadd.f32 %v433_v35, %v386_v29 }
  0xca   :  { %v803_v6 = vpop.f32.mrf.mxu2 }
  0xcb   :  { %v805_v7 = vpop.f32.mrf.mxu3  ;;  %327 = vst [vmem:[#allocation7 + $0xb0] sm:$0xff] %v803_v6 }
  0xcc   :  { %v226_v8 = vpop.f32.mrf.mxu0  ;;  %328 = vst [vmem:[#allocation7 + $0xb8] sm:$0xff] %v805_v7 }
  0xcd   :  { %313 = vst [vmem:[#allocation7 + $0x40] sm:$0xff] %v226_v8  ;;  %v275_v9 = vpop.f32.mrf.mxu1  ;;  %v387_v33 = vmul.f32 %v226_v8, %v226_v8  ;;  %v340_v39 = vadd.f32 %v339_v32, %v226_v8  ;;  %v395_v8 = vmul.f32 %v785_v58, %v785_v58 }
  0xce   :  { %314 = vst [vmem:[#allocation7 + $0x48] sm:$0xff] %v275_v9  ;;  %v388_v37 = vmul.f32 %v275_v9, %v275_v9  ;;  %v361_v42 = vadd.f32 %v360_v36, %v275_v9 }
  0xcf   :  { %v414_v44 = vadd.f32 %v413_v38, %v387_v33 }
  0xd0   :  { %v435_v47 = vadd.f32 %v434_v41, %v388_v37 }
  0xd2   :  { %v809_v10 = vpop.f32.mrf.mxu2 }
  0xd3   :  { %v811_v11 = vpop.f32.mrf.mxu3  ;;  %329 = vst [vmem:[#allocation7 + $0xc0] sm:$0xff] %v809_v10 }
  0xd4   :  { %v228_v12 = vpop.f32.mrf.mxu0  ;;  %330 = vst [vmem:[#allocation7 + $0xc8] sm:$0xff] %v811_v11  ;;  %v404_v35 = vmul.f32 %v811_v11, %v811_v11 }
  0xd5   :  { %315 = vst [vmem:[#allocation7 + $0x50] sm:$0xff] %v228_v12  ;;  %v277_v13 = vpop.f32.mrf.mxu1  ;;  %v389_v40 = vmul.f32 %v228_v12, %v228_v12  ;;  %v341_v45 = vadd.f32 %v340_v39, %v228_v12 }
  0xd6   :  { %316 = vst [vmem:[#allocation7 + $0x58] sm:$0xff] %v277_v13  ;;  %v390_v43 = vmul.f32 %v277_v13, %v277_v13  ;;  %v362_v48 = vadd.f32 %v361_v42, %v277_v13  ;;  %v396_v13 = vmul.f32 %v787_v59, %v787_v59 }
  0xd7   :  { %v415_v51 = vadd.f32 %v414_v44, %v389_v40 }
  0xd8   :  { %v436_v54 = vadd.f32 %v435_v47, %v390_v43 }
  0xda   :  { %v815_v22 = vpop.f32.mrf.mxu2 }
  0xdb   :  { %v817_v26 = vpop.f32.mrf.mxu3  ;;  %331 = vst [vmem:[#allocation7 + $0xd0] sm:$0xff] %v815_v22  ;;  %v405_v37 = vmul.f32 %v815_v22, %v815_v22 }
  0xdc   :  { %v231_v30 = vpop.f32.mrf.mxu0  ;;  %332 = vst [vmem:[#allocation7 + $0xd8] sm:$0xff] %v817_v26 }
  0xdd   :  { %317 = vst [vmem:[#allocation7 + $0x60] sm:$0xff] %v231_v30  ;;  %v280_v34 = vpop.f32.mrf.mxu1  ;;  %v391_v46 = vmul.f32 %v231_v30, %v231_v30  ;;  %v342_v52 = vadd.f32 %v341_v45, %v231_v30 }
  0xde   :  { %318 = vst [vmem:[#allocation7 + $0x68] sm:$0xff] %v280_v34  ;;  %v392_v49 = vmul.f32 %v280_v34, %v280_v34  ;;  %v363_v55 = vadd.f32 %v362_v48, %v280_v34 }
  0xdf   :  { %v416_v57 = vadd.f32 %v415_v51, %v391_v46 }
  0xe0   :  { %v437_v1 = vadd.f32 %v436_v54, %v392_v49 }
  0xe2   :  { %v821_v50 = vpop.f32.mrf.mxu2 }
  0xe3   :  { %v823_v53 = vpop.f32.mrf.mxu3  ;;  %333 = vst [vmem:[#allocation7 + $0xe0] sm:$0xff] %v821_v50  ;;  %v407_v42 = vmul.f32 %v821_v50, %v821_v50 }
  0xe4   :  { %v233_v56 = vpop.f32.mrf.mxu0  ;;  %334 = vst [vmem:[#allocation7 + $0xe8] sm:$0xff] %v823_v53  ;;  %v408_v44 = vmul.f32 %v823_v53, %v823_v53 }
  0xe5   :  { %319 = vst [vmem:[#allocation7 + $0x70] sm:$0xff] %v233_v56  ;;  %v343_v60 = vadd.f32 %v342_v52, %v233_v56  ;;  %v393_v61 = vmul.f32 %v233_v56, %v233_v56  ;;  %v282_v0 = vpop.f32.mrf.mxu1 }
  0xe6   :  { %320 = vst [vmem:[#allocation7 + $0x78] sm:$0xff] %v282_v0  ;;  %v364_v4 = vadd.f32 %v363_v55, %v282_v0  ;;  %v394_v5 = vmul.f32 %v282_v0, %v282_v0 }
  0xe7   :  { %v344_v9 = vadd.f32 %v343_v60, %v785_v58  ;;  %v417_v12 = vadd.f32 %v416_v57, %v393_v61 }
  0xe8   :  { %v365_v14 = vadd.f32 %v364_v4, %v787_v59  ;;  %v438_v15 = vadd.f32 %v437_v1, %v394_v5 }
  0xe9   :  { %v345_v17 = vadd.f32 %v344_v9, %v791_v62  ;;  %v418_v18 = vadd.f32 %v417_v12, %v395_v8  ;;  %v400_v62 = vmul.f32 %v799_v3, %v799_v3 }
  0xea   :  { %v366_v58 = vadd.f32 %v365_v14, %v793_v63  ;;  %v439_v20 = vadd.f32 %v438_v15, %v396_v13  ;;  %v253_v21 = vpop.f32.mrf.mxu2  ;;  %v401_v63 = vmul.f32 %v803_v6, %v803_v6 }
  0xeb   :  { %v346_v59 = vadd.f32 %v345_v17, %v797_v2  ;;  %v419_v24 = vadd.f32 %v418_v18, %v397_v16  ;;  %v302_v25 = vpop.f32.mrf.mxu3  ;;  %335 = vst [vmem:[#allocation7 + $0xf0] sm:$0xff] %v253_v21  ;;  %v402_v2 = vmul.f32 %v805_v7, %v805_v7  ;;  %v409_v47 = vmul.f32 %v253_v21, %v253_v21 }
  0xec   :  { %v367_v27 = vadd.f32 %v366_v58, %v799_v3  ;;  %v440_v28 = vadd.f32 %v439_v20, %v398_v19  ;;  %336 = vst [vmem:[#allocation7 + $0xf8] sm:$0xff] %v302_v25  ;;  %v403_v3 = vmul.f32 %v809_v10, %v809_v10  ;;  %v410_v51 = vmul.f32 %v302_v25, %v302_v25 }
  0xed   :  { %v420_v29 = vadd.f32 %v419_v24, %v399_v23  ;;  %v347_v30 = vadd.f32 %v346_v59, %v803_v6  ;;  %475 = dma.vmem_to_hbm [thread:$0]  %s468_s1, 4096, %s470_s28, [#allocation4], %s756_s2, %s756_s2, %s757_s29  }
  0xee   :  { %v441_v31 = vadd.f32 %v440_v28, %v400_v62  ;;  %v368_v32 = vadd.f32 %v367_v27, %v805_v7  ;;  %v406_v7 = vmul.f32 %v817_v26, %v817_v26 }
  0xef   :  { %v348_v33 = vadd.f32 %v347_v30, %v809_v10  ;;  %v421_v34 = vadd.f32 %v420_v29, %v401_v63 }
  0xf0   :  { %v369_v6 = vadd.f32 %v368_v32, %v811_v11  ;;  %v442_v36 = vadd.f32 %v441_v31, %v402_v2 }
  0xf1   :  { %v349_v38 = vadd.f32 %v348_v33, %v815_v22  ;;  %v422_v39 = vadd.f32 %v421_v34, %v403_v3 }
  0xf2   :  { %v370_v40 = vadd.f32 %v369_v6, %v817_v26  ;;  %v443_v41 = vadd.f32 %v442_v36, %v404_v35 }
  0xf3   :  { %v350_v10 = vadd.f32 %v349_v38, %v821_v50  ;;  %v423_v43 = vadd.f32 %v422_v39, %v405_v37 }
  0xf4   :  { %v371_v11 = vadd.f32 %v370_v40, %v823_v53  ;;  %v444_v45 = vadd.f32 %v443_v41, %v406_v7 }
  0xf5   :  { %v424_v22 = vadd.f32 %v423_v43, %v407_v42  ;;  %v351_v46 = vadd.f32 %v350_v10, %v253_v21 }
  0xf6   :  { %v445_v48 = vadd.f32 %v444_v45, %v408_v44  ;;  %v372_v49 = vadd.f32 %v371_v11, %v302_v25 }
  0xf7   :  { %v352_v26 = vrot.slane %v351_v46, 4  ;;  %v425_v52 = vadd.f32 %v424_v22, %v409_v47 }
  0xf8   :  { %v373_v54 = vrot.slane %v372_v49, 4  ;;  %v446_v55 = vadd.f32 %v445_v48, %v410_v51 }
  0xf9   :  { %v353_v56 = vadd.f32 %v352_v26, %v351_v46  ;;  %v426_v57 = vrot.slane %v425_v52, 4 }
  0xfa   :  { %v374_v50 = vadd.f32 %v373_v54, %v372_v49  ;;  %v447_v60 = vrot.slane %v446_v55, 4 }
  0xfb   :  { %v354_v61 = vrot.slane %v353_v56, 2  ;;  %v427_v0 = vadd.f32 %v426_v57, %v425_v52 }
  0xfc   :  { %v375_v1 = vrot.slane %v374_v50, 2  ;;  %v448_v4 = vadd.f32 %v447_v60, %v446_v55 }
  0xfd   :  { %v428_v53 = vrot.slane %v427_v0, 2  ;;  %v355_v9 = vadd.f32 %v354_v61, %v353_v56 }
  0xfe   :  { %v376_v5 = vadd.f32 %v375_v1, %v374_v50  ;;  %v449_v8 = vrot.slane %v448_v4, 2 }
  0xff   :  { %v429_v12 = vadd.f32 %v428_v53, %v427_v0  ;;  %v356_v17 = vrot.slane %v355_v9, 1 }
 0x100   :  { %v377_v13 = vrot.slane %v376_v5, 1  ;;  %v450_v14 = vadd.f32 %v449_v8, %v448_v4 }
 0x101   :  { %v430_v15 = vrot.slane %v429_v12, 1  ;;  %v357_v20 = vadd.f32 %v356_v17, %v355_v9 }
 0x102   :  { %v451_v16 = vrot.slane %v450_v14, 1  ;;  %v378_v18 = vadd.f32 %v377_v13, %v376_v5 }
 0x103   :  { %v431_v58 = vadd.f32 %v430_v15, %v429_v12 }
 0x104   :  { %v452_v19 = vadd.f32 %v451_v16, %v450_v14 }
 0x105   :  { %v454_v59 = vsel %vm453_vm0, %v357_v20, %v431_v58 }
 0x106   :  { %v455_v21 = vsel %vm453_vm0, %v378_v18, %v452_v19 }
 0x107   :  { %v458_v23 = vrot.slane %v455_v21, 6 }
 0x109   :  { %v460_v24 = vsel %vm459_vm1, %v454_v59, %v458_v23 }
 0x10a   :  { %462 = vst [vmem:[#allocation8] sm:$0xf] %v460_v24 }
 0x10b   :  { %486 = dma.vmem_to_hbm [thread:$0]  %s482_s4, 64, %s484_s7, [#allocation9]  }
 0x10c   :  { %745 = dma.done.wait [#allocation4], 4096  }
 0x10d   :  { %746 = vsyncadd [#allocation4], 4294963200 }
 0x10e   :  { %747 = dma.done.wait [#allocation9], 64  }
 0x10f   :  { %748 = vsyncadd [#allocation9], 4294967232 }
 0x110   :  { %495 = vsyncpa [#allocation3], 1 }
 0x111   :  { %496 = vsyncpa [#allocation6], 1 }
 0x112   :  { %497 = vsyncpa [#allocation4], 1 }
 0x113   :  { %498 = vsyncpa [#allocation9], 1 }

</bundles_post_ra>
